<compile_context>
chip_gen: v7x
topology: tpu7x:2x2x1
jax: 0.10.0
libtpu: 0.0.40
codegen_flags: <defaults>
</compile_context>

<pallas_src>
import functools

import jax
import jax.numpy as jnp
from jax.experimental import pallas as pl
from jax.experimental.pallas import tpu as pltpu

_LANE = 128
# Candidate slab widths, widest lane-dense stripe preferred.
_WIDTHS = (4096, 2048, 1024, 512, 256, 128)
# Below this many elements the jnp path is strictly better (fusible, no
# kernel-launch / pipeline-prime overhead).  Typical parametrizer weights are
# only a few thousand elements.
_SMALL_N = 128 * 1024


def _sublane_quantum(dtype) -> int:
    # second-to-last-dim packing quantum: f32 -> 8, bf16/f16 -> 16
    itemsize = jnp.dtype(dtype).itemsize
    return {4: 8, 2: 16, 1: 32}.get(itemsize, 8)


@functools.lru_cache(maxsize=None)
def _tile_config():
    """Returns (tile_bytes_per_block, vmem_limit_bytes), generation-aware."""
    mib = 1024 * 1024
    vmem_cap = None
    try:
        vmem_cap = getattr(pltpu.get_tpu_info(), "vmem_capacity_bytes", None)
    except Exception:
        vmem_cap = None
    kind = ""
    try:
        kind = jax.devices()[0].device_kind.lower()
    except Exception:
        kind = ""
    # v7x: 64 MiB/TC VMEM, ~3.2 TB/s HBM -> big tiles, raised scoped limit.
    is_v7 = ("v7" in kind) or (vmem_cap is not None and vmem_cap <= 80 * mib)
    if is_v7:
        # 8 MiB tiles: double-buffered in+out = 32 MiB, 48 MiB limit headroom.
        return 8 * mib, 48 * mib
    if "v6" in kind:
        # ~1.4 TB/s: 4 MiB tiles keep per-step overhead at a few percent.
        return 4 * mib, 32 * mib
    # v5e / unknown: ~0.8 TB/s, 2 MiB tiles are already ~85% of roofline.
    return 2 * mib, 32 * mib


def _nonneg_kernel(x_ref, o_ref, *, bound, pedestal):
    # f32 internal math is free (HBM-bound) and keeps bf16 close to f32 ref.
    x = x_ref[...].astype(jnp.float32)
    y = jnp.maximum(x, jnp.float32(bound))
    o_ref[...] = (y * y - jnp.float32(pedestal)).astype(o_ref.dtype)


def _nonneg_jnp(x, bound, pedestal):
    y = jnp.maximum(x.astype(jnp.float32), jnp.float32(bound))
    return (y * y - jnp.float32(pedestal)).astype(x.dtype)


def _block_rows(rows, width, sub, target_elems):
    """Rows per grid step: ~target_elems per block, multiple of `sub`,
    capped so the grid has >= 2 steps whenever possible (both v7x TCs engage)."""
    br = max(sub, (target_elems // width) // sub * sub)
    if rows >= 2 * sub:
        cap = max(sub, (pl.cdiv(rows, 2) // sub) * sub)
        br = min(br, cap)
    if br >= rows:
        return rows  # single block; full-dim block shape is always legal
    return br        # multiple of sub; ragged last block is masked by Pallas


def _run_pallas_2d(flat, width, bound, pedestal, sub):
    """flat: 1D array whose length is a positive multiple of `width`."""
    n = flat.shape[0]
    rows = n // width
    dtype = flat.dtype

    tile_bytes, vmem_limit = _tile_config()
    target_elems = max(_LANE * sub, tile_bytes // jnp.dtype(dtype).itemsize)
    br = _block_rows(rows, width, sub, target_elems)

    slab = flat.reshape(rows, width)
    kernel = functools.partial(_nonneg_kernel, bound=bound, pedestal=pedestal)
    out_slab = pl.pallas_call(
        kernel,
        out_shape=jax.ShapeDtypeStruct((rows, width), dtype),
        grid=(pl.cdiv(rows, br),),
        in_specs=[pl.BlockSpec((br, width), lambda i: (i, 0))],
        out_specs=pl.BlockSpec((br, width), lambda i: (i, 0)),
        compiler_params=pltpu.CompilerParams(
            dimension_semantics=("parallel",),
            vmem_limit_bytes=vmem_limit,
        ),
    )(slab)
    return out_slab.reshape(-1)


def non_negative_parametrizer_forward(
    x: jax.Array,
    minimum: float = 0.0,
    reparam_offset: float = 2.0 ** (-18),
) -> jax.Array:
    """Elementwise max(x, bound)**2 - pedestal, matching NonNegativeParametrizer.forward."""
    if not jnp.issubdtype(x.dtype, jnp.floating):
        raise TypeError(
            "non_negative_parametrizer_forward expects a floating dtype; got "
            f"{x.dtype} (bound/pedestal would round to 0 and y*y would overflow)."
        )

    pedestal = float(reparam_offset) ** 2
    bound = (float(minimum) + pedestal) ** 0.5

    orig_shape = x.shape
    n = x.size
    if n == 0:
        return x
    if n < _SMALL_N:
        # Tiny per-channel weight vectors: fusible jnp path, no kernel overhead.
        return _nonneg_jnp(x, bound, pedestal)

    flat = x.reshape(-1)
    sub = _sublane_quantum(x.dtype)

    # Lane-aligned main slab.  When n is a multiple of 128 (the common case for
    # large tensors) the whole array goes through one pallas_call; the ragged
    # last row-block is masked by Pallas, so no pad and no concat re-stream.
    n_main = (n // _LANE) * _LANE
    width = next(w for w in _WIDTHS if n_main % w == 0)

    main = flat if n_main == n else flat[:n_main]
    main_out = _run_pallas_2d(main, width, bound, pedestal, sub)
    if n_main == n:
        return main_out.reshape(orig_shape)

    # Rare fallback: size not a multiple of 128 -> tiny (<128 elem) jnp tail.
    tail_out = _nonneg_jnp(flat[n_main:], bound, pedestal)
    return jnp.concatenate([main_out, tail_out]).reshape(orig_shape)


def _reference(x, minimum=0.0, reparam_offset=2.0 ** (-18)):
    pedestal = reparam_offset ** 2
    bound = (minimum + pedestal) ** 0.5
    y = jnp.maximum(x, jnp.asarray(bound, x.dtype))
    return y * y - jnp.asarray(pedestal, x.dtype)


if __name__ == "__main__":
    key = jax.random.PRNGKey(0)

    # Small NCHW demo consistent with how this parametrizer wraps conv/GDN weights.
    x = jax.random.normal(key, (2, 4, 16, 16), dtype=jnp.float32)
    out = jax.block_until_ready(non_negative_parametrizer_forward(x))
    assert out.shape == x.shape and out.dtype == x.dtype
    assert jnp.allclose(out, _reference(x), atol=1e-6, rtol=1e-6), "small mismatch"

    key, k1, k2, k3, k4 = jax.random.split(key, 5)

    # Pallas path, fully aligned (single slab, no tail).
    x_big = jax.random.normal(k1, (512, 512), dtype=jnp.float32)
    o_big = jax.block_until_ready(non_negative_parametrizer_forward(x_big))
    assert jnp.allclose(o_big, _reference(x_big), atol=1e-6, rtol=1e-6), "aligned mismatch"

    # Pallas path with rows not a multiple of the sublane quantum (masked last block).
    x_rag = jax.random.normal(k2, (2049, 128), dtype=jnp.float32)
    o_rag = jax.block_until_ready(non_negative_parametrizer_forward(x_rag))
    assert jnp.allclose(o_rag, _reference(x_rag), atol=1e-6, rtol=1e-6), "ragged mismatch"

    # Size not a multiple of 128: kernel prefix + tiny jnp tail.
    x_odd = jax.random.normal(k3, (1000, 263), dtype=jnp.float32)
    o_odd = jax.block_until_ready(non_negative_parametrizer_forward(x_odd))
    assert jnp.allclose(o_odd, _reference(x_odd), atol=1e-6, rtol=1e-6), "tail mismatch"

    # bf16 packing (16-row sublane quantum), f32 internal math.
    x_bf = jax.random.normal(k4, (256, 2048), dtype=jnp.bfloat16)
    o_bf = jax.block_until_ready(non_negative_parametrizer_forward(x_bf))
    assert o_bf.dtype == jnp.bfloat16
    assert jnp.allclose(
        o_bf.astype(jnp.float32), _reference(x_bf).astype(jnp.float32),
        atol=1e-2, rtol=1e-2,
    ), "bf16 mismatch"

    print("KERNEL_OK")
</pallas_src>

<mosaic_0001>
module attributes {stable_mosaic.version = 11 : i64} {
  func.func @_nonneg_kernel(%arg0: i32, %arg1: memref<32x4096xf32, #tpu.memory_space<vmem>>, %arg2: memref<32x4096xf32, #tpu.memory_space<vmem>>) attributes {dimension_semantics = [#tpu.dimension_semantics<parallel>], iteration_bounds = array<i64: 2>, scalar_prefetch = 0 : i64, scratch_operands = 0 : i64, tpu.core_type = #tpu.core_type<tc>, window_params = [{transform_indices = @transform_0, window_bounds = array<i64: 32, 4096>}, {transform_indices = @transform_1, window_bounds = array<i64: 32, 4096>}]} {
    %c0 = arith.constant 0 : index
    %c0_0 = arith.constant 0 : index
    %0 = vector.load %arg1[%c0, %c0_0] : memref<32x4096xf32, #tpu.memory_space<vmem>>, vector<32x4096xf32>
    %cst = arith.constant 3.81469727E-6 : f32
    %1 = vector.broadcast %cst : f32 to vector<32x4096xf32>
    %2 = arith.maximumf %0, %1 : vector<32x4096xf32>
    %3 = arith.mulf %2, %2 : vector<32x4096xf32>
    %cst_1 = arith.constant 1.45519152E-11 : f32
    %4 = vector.broadcast %cst_1 : f32 to vector<32x4096xf32>
    %5 = arith.subf %3, %4 : vector<32x4096xf32>
    %c0_2 = arith.constant 0 : index
    %c0_3 = arith.constant 0 : index
    %6 = vector.load %arg2[%c0_2, %c0_3] : memref<32x4096xf32, #tpu.memory_space<vmem>>, vector<32x4096xf32>
    tpu.vector_store %arg2[%c0_2, %c0_3], %5 {strides = array<i32>} : memref<32x4096xf32, #tpu.memory_space<vmem>>, vector<32x4096xf32>,
    return
  }
  func.func @transform_0(%arg0: i32) -> (i32, i32) {
    %c0_i32 = arith.constant 0 : i32
    %c0_i32_0 = arith.constant 0 : i32
    return %arg0, %c0_i32 : i32, i32
  }
  func.func @transform_1(%arg0: i32) -> (i32, i32) {
    %c0_i32 = arith.constant 0 : i32
    %c0_i32_0 = arith.constant 0 : i32
    return %arg0, %c0_i32 : i32, i32
  }
}

</mosaic_0001>

<bundles_post_ra>
// kernel: tpu_custom_call.1
= control target key start
LH: loop header
LB: loop body
LE: loop exit
PB: predicated region body
PF: predicated region fallthrough
CT: control target
= control target key end

     0   :  { %6 = vsyncpa [#allocation3], 0  ;;  %s1605_s0 = inlined_call_operand.hbm [shape: f32[64,4096], index: 0, kind: input, shape index: {}]   ;;  %s1606_s1 = inlined_call_operand.hbm [shape: f32[64,4096], index: 1, kind: output, shape index: {}]  }
   0x1   :  { %8 = vsyncpa [#allocation3 + $0x1], 0 }
   0x2   :  { %9 = vsyncpa [#allocation4], 0 }
   0x3   :  { %11 = vsyncpa [#allocation4 + $0x1], 0  ;;  %s1178_s6 = smov 0   ;;  %s1180_s7 = smov 0  }
   0x4   :  { %s1182_s8 = smov 0   ;;  %s1184_s9 = smov 0  }
   0x5 LB: > { %s1199_s10 = sadd.s32 4294967295, %s1160_s9   ;;  %s866_s11 = sadd.s32 4294967294, %s1160_s9   ;;  %s1160_s9 = sphi %s1184_s9, %s1619_s9   ;;  %s1156_s8 = sphi %s1182_s8, %s1618_s8   ;;  %s1152_s7 = sphi %s1180_s7, %s1617_s7   ;;  %s1148_s6 = sphi %s1178_s6, %s1616_s6  }
   0x6   : > { %s1203_s12 = sadd.s32 1, %s1160_s9   ;;  %s24_s13 = sadd.s32 1, %s1156_s8 }
   0x7   : > { %s21_s14 = ssub.s32 %s1160_s9, %s1203_s12  ;;  %p31_p0 = scmp.ne.s32.totalorder %s1156_s8, %s1152_s7 }
   0x8   : > { %p22_p1 = scmp.eq.s32.totalorder %s21_s14, 0  ;;  %p32_p2 = scmp.eq.s32.totalorder %s1160_s9, 0 }
   0x9   : > { %p37_p3 = scmp.ne.s32.totalorder %s1152_s7, %s1148_s6  ;;  %p38_p4 = scmp.eq.s32.totalorder %s1199_s10, 0 }
   0xa   : > { %s1215_s15 = scalar_select %p22_p1, %s1156_s8, %s24_s13  }
   0xb   : > { %p1217_p5 = por %p32_p2, %p31_p0  ;;  %p1221_p6 = por %p38_p4, %p37_p3 }
   0xc   : > { %p61_p7 = scmp.eq.s32.totalorder %s1199_s10, 1  ;;  %p67_p8 = scmp.eq.s32.totalorder %s866_s11, 1 }
   0xd   : > { %p1026_p10 = scmp.lt.s32.totalorder %s1160_s9, 2  ;;  %s87_s20 = sand.u32 1, %s1156_s8  }
   0xe   : > { %p1228_p11 = por %p61_p7, %p31_p0  ;;  %p1232_p12 = por %p67_p8, %p37_p3 }
   0xf   : > { %s1011_s21 = sshll.u32 %s1160_s9, 14  ;;  %s869_s22 = sshll.u32 %s87_s20, 10 }
  0x10   : > { %s1610_s18 = scalar_select %p1228_p11, 1, 0 }
  0x11   : > { %s1611_s19 = scalar_select %p1232_p12, 1, 0 }
  0x12   : > { %s1241_s25 = scalar_lea.hbm %s1605_s0, %s1011_s21  ;;  %s91_s26 = scalar_lea.vmem [#allocation2], %s869_s22 }
  0x13   : > { %s99_s27 = sshll.u32 %s91_s26, 4  ;;  %p1245_p13 = pnand %p1026_p10, %p1217_p5  ;;  %s1249_s27 = int_to_ptr.vmem [resolvable:$true] %s99_s27 }
  0x14   : > { %s1251_s29 = scalar_lea.sflag [#allocation3], %s87_s20  ;;  %s1064_s30 = scalar_lea.hbm %s1241_s25, 16384 }
  0x15   : > { %p1065_p0 = scmp.ne.s32.totalorder %s1241_s25, %s1064_s30  ;;  %p1066_p1 = pneg %p1245_p13 }
  0x16   : > { %s1069_s4 = scalar_lea.hbm %s1605_s0, 32768  ;;  %p1070_p4 = scmp.lt.u32.totalorder %s1241_s25, %s1605_s0 }
  0x17   : > { %p1067_p2 = pnand %p1066_p1, %p1065_p0  ;;  %p1071_p5 = scmp.lt.u32.totalorder %s1069_s4, %s1064_s30 }
  0x18   : > { %p1073_p8 = scmp.lt.u32.totalorder %s1064_s30, %s1241_s25 }
  0x19   : > { %p1068_p3 = pneg %p1067_p2  ;;  %p1072_p7 = por %p1071_p5, %p1070_p4 }
  0x1b   : > { %p1074_p10 = por %p1073_p8, %p1072_p7 }
  0x1d   : > { %p1075_p9 = pnand %p1074_p10, %p1068_p3 }
  0x1f   : > { %1078 = shalt.err (!%p1075_p9)
}
  0x20   : > { %s1079_s13 = scalar_lea.vmem %s1249_s27, 16384  ;;  %s1162_s14 = smov [#allocation2]  }
  0x21   : > { %p1080_p0 = scmp.ne.s32.totalorder %s1249_s27, %s1079_s13  ;;  %s1084_s16 = sshll.u32 %s1162_s14, 4  ;;  %s1085_s16 = int_to_ptr.vmem [resolvable:$false] %s1084_s16 }
  0x22   : > { %s1086_s20 = scalar_lea.vmem %s1085_s16, 32768  ;;  %p1087_p11 = scmp.lt.s32.totalorder %s1249_s27, %s1085_s16 }
  0x23   : > { %p1082_p2 = pnand %p1080_p0, %p1066_p1  ;;  %p1088_p4 = scmp.lt.s32.totalorder %s1086_s20, %s1079_s13 }
  0x25   : > { %p1083_p12 = pneg %p1082_p2  ;;  %p1089_p5 = por %p1088_p4, %p1087_p11 }
  0x27   : > { %p1090_p7 = pnand %p1089_p5, %p1083_p12 }
  0x29   : > { %1093 = shalt.err (!%p1090_p7)
}
  0x2a   : > { %s1163_s21 = smov 4096   ;;  %s1164_s22 = smov 256  }
  0x2b   : > { %1021 = dma.hbm_to_vmem [thread:$0]  (!%p1245_p13), %s1241_s25, 16384, %s1249_s27, %s1251_s29, %s1163_s21, %s1163_s21, %s1164_s22  }
  0x2c   : > { %p873_p9 = scmp.ge.s32.totalorder %s1160_s9, 1  ;;  %p107_p1 = scmp.lt.s32.totalorder %s1160_s9, 3 }
  0x2e   : > { %p108_p3 = pnand %p873_p9, %p107_p1 }
  0x2f   : > { %s1282_s23 = sand.u32 (!%p108_p3), 1, %s1152_s7  }
  0x30   : > { %111 = sbr.rel (%p108_p3) target bundleno = 171 (0xab), region = 24  ;;  %s874_s24 = sshll.u32 (!%p108_p3), %s1282_s23, 10 }
  0x31   : > { %s114_s26 = scalar_lea.sflag (!%p108_p3), [#allocation3], %s1282_s23  ;;  %s1288_s30 = scalar_lea.vmem (!%p108_p3), [#allocation2], %s874_s24 }
  0x37   : > { %1139 = dma.done.wait (%p1221_p6), %s114_s26, 16384  }
  0x38   : > { %1141 = vsyncadd (%p1221_p6), %s114_s26, 4294950912  ;;  %v138_v0 = vld [vmem:[%s1288_s30] sm:$0xff]  ;;  %v139_v1 = vld [vmem:[%s1288_s30 + $0x8] sm:$0xff]  ;;  %s1311_s17 = scalar_lea.vmem [#allocation5], %s874_s24  ;;  %s1013_s25 = sshll.u32 %s1199_s10, 14 }
  0x39   : > { %v140_v2 = vld [vmem:[%s1288_s30 + $0x10] sm:$0xff]  ;;  %v266_v3 = vmax.f32 %v138_v0, 3.8146973e-06  ;;  %v267_v4 = vmax.f32 %v139_v1, 3.8146973e-06  ;;  %v141_v6 = vld [vmem:[%s1288_s30 + $0x18] sm:$0xff]  ;;  %v142_v7 = vld [vmem:[%s1288_s30 + $0x20] sm:$0xff]  ;;  %s793_s27 = sshll.u32 %s1311_s17, 4  ;;  %s1554_s29 = scalar_lea.hbm %s1606_s1, %s1013_s25  ;;  %s1556_s27 = int_to_ptr.vmem [resolvable:$true] %s793_s27 }
  0x3a   : > { %v268_v5 = vmax.f32 %v140_v2, 3.8146973e-06  ;;  %v143_v8 = vld [vmem:[%s1288_s30 + $0x28] sm:$0xff]  ;;  %v269_v9 = vmax.f32 %v141_v6, 3.8146973e-06  ;;  %v270_v10 = vmax.f32 %v142_v7, 3.8146973e-06  ;;  %v144_v12 = vld [vmem:[%s1288_s30 + $0x30] sm:$0xff]  ;;  %v145_v13 = vld [vmem:[%s1288_s30 + $0x38] sm:$0xff] }
  0x3b   : > { %v271_v11 = vmax.f32 %v143_v8, 3.8146973e-06  ;;  %v394_v14 = vmul.f32 %v266_v3, %v266_v3  ;;  %v395_v15 = vmul.f32 %v267_v4, %v267_v4  ;;  %v272_v17 = vmax.f32 %v144_v12, 3.8146973e-06  ;;  %v146_v22 = vld [vmem:[%s1288_s30 + $0x40] sm:$0xff]  ;;  %v147_v23 = vld [vmem:[%s1288_s30 + $0x48] sm:$0xff]  ;;  %v148_v24 = vld [vmem:[%s1288_s30 + $0x50] sm:$0xff]  ;;  %s779_s2 = scalar_lea.sflag [#allocation4], %s1282_s23 }
  0x3c   : > { %v396_v16 = vmul.f32 %v268_v5, %v268_v5  ;;  %v397_v18 = vmul.f32 %v269_v9, %v269_v9  ;;  %v398_v19 = vmul.f32 %v270_v10, %v270_v10  ;;  %v273_v21 = vmax.f32 %v145_v13, 3.8146973e-06  ;;  %v149_v29 = vld [vmem:[%s1288_s30 + $0x58] sm:$0xff]  ;;  %v150_v30 = vld [vmem:[%s1288_s30 + $0x60] sm:$0xff]  ;;  %v151_v31 = vld [vmem:[%s1288_s30 + $0x68] sm:$0xff]  ;;  %s1094_s3 = scalar_lea.vmem %s1556_s27, 16384  ;;  %p1613_p11 = scmp.ne.s32.totalorder %s1610_s18, 0 }
  0x3d   : > { %v399_v20 = vmul.f32 %v271_v11, %v271_v11  ;;  %v876_v25 = vadd.f32 -1.4551915e-11, %v394_v14  ;;  %v877_v26 = vadd.f32 -1.4551915e-11, %v395_v15  ;;  %v400_v28 = vmul.f32 %v272_v17, %v272_v17  ;;  %v152_v36 = vld [vmem:[%s1288_s30 + $0x70] sm:$0xff]  ;;  %v153_v41 = vld [vmem:[%s1288_s30 + $0x78] sm:$0xff]  ;;  %v154_v54 = vld [vmem:[%s1288_s30 + $0x80] sm:$0xff]  ;;  %p1095_p6 = scmp.ne.s32.totalorder %s1556_s27, %s1094_s3  ;;  %s1165_s4 = smov [#allocation5]  }
  0x3e   : > { %v878_v27 = vadd.f32 -1.4551915e-11, %v396_v16  ;;  %v879_v32 = vadd.f32 -1.4551915e-11, %v397_v18  ;;  %v880_v33 = vadd.f32 -1.4551915e-11, %v398_v19  ;;  %v401_v35 = vmul.f32 %v273_v21, %v273_v21  ;;  %v155_v55 = vld [vmem:[%s1288_s30 + $0x88] sm:$0xff]  ;;  %v156_v56 = vld [vmem:[%s1288_s30 + $0x90] sm:$0xff]  ;;  %v157_v61 = vld [vmem:[%s1288_s30 + $0x98] sm:$0xff] }
  0x3f   : > { %v881_v34 = vadd.f32 -1.4551915e-11, %v399_v20  ;;  %650 = vst [vmem:[%s1311_s17] sm:$0xff] %v876_v25  ;;  %651 = vst [vmem:[%s1311_s17 + $0x8] sm:$0xff] %v877_v26  ;;  %v882_v37 = vadd.f32 -1.4551915e-11, %v400_v28  ;;  %v274_v38 = vmax.f32 %v146_v22, 3.8146973e-06  ;;  %v275_v39 = vmax.f32 %v147_v23, 3.8146973e-06  ;;  %v158_v62 = vld [vmem:[%s1288_s30 + $0xa0] sm:$0xff]  ;;  %p1096_p12 = pnand %p1095_p6, %p1613_p11 }
  0x40   : > { %652 = vst [vmem:[%s1311_s17 + $0x10] sm:$0xff] %v878_v27  ;;  %v276_v40 = vmax.f32 %v148_v24, 3.8146973e-06  ;;  %653 = vst [vmem:[%s1311_s17 + $0x18] sm:$0xff] %v879_v32  ;;  %v883_v42 = vadd.f32 -1.4551915e-11, %v401_v35  ;;  %v277_v43 = vmax.f32 %v149_v29, 3.8146973e-06  ;;  %v278_v44 = vmax.f32 %v150_v30, 3.8146973e-06 }
  0x41   : > { %654 = vst [vmem:[%s1311_s17 + $0x20] sm:$0xff] %v880_v33  ;;  %655 = vst [vmem:[%s1311_s17 + $0x28] sm:$0xff] %v881_v34  ;;  %v279_v45 = vmax.f32 %v151_v31, 3.8146973e-06  ;;  %v402_v46 = vmul.f32 %v274_v38, %v274_v38  ;;  %v403_v47 = vmul.f32 %v275_v39, %v275_v39  ;;  %v280_v49 = vmax.f32 %v152_v36, 3.8146973e-06  ;;  %v159_v63 = vld [vmem:[%s1288_s30 + $0xa8] sm:$0xff]  ;;  %v160_v4 = vld [vmem:[%s1288_s30 + $0xb0] sm:$0xff]  ;;  %p1097_p13 = pneg %p1096_p12 }
  0x42   : > { %656 = vst [vmem:[%s1311_s17 + $0x30] sm:$0xff] %v882_v37  ;;  %v404_v48 = vmul.f32 %v276_v40, %v276_v40  ;;  %657 = vst [vmem:[%s1311_s17 + $0x38] sm:$0xff] %v883_v42  ;;  %v405_v50 = vmul.f32 %v277_v43, %v277_v43  ;;  %v406_v51 = vmul.f32 %v278_v44, %v278_v44  ;;  %v281_v53 = vmax.f32 %v153_v41, 3.8146973e-06  ;;  %v161_v9 = vld [vmem:[%s1288_s30 + $0xb8] sm:$0xff]  ;;  %v162_v22 = vld [vmem:[%s1288_s30 + $0xc0] sm:$0xff]  ;;  %s1098_s5 = sshll.u32 %s1165_s4, 4  ;;  %s1099_s5 = int_to_ptr.vmem [resolvable:$false] %s1098_s5 }
  0x43   : > { %v407_v52 = vmul.f32 %v279_v45, %v279_v45  ;;  %v884_v57 = vadd.f32 -1.4551915e-11, %v402_v46  ;;  %v885_v58 = vadd.f32 -1.4551915e-11, %v403_v47  ;;  %v408_v60 = vmul.f32 %v280_v49, %v280_v49  ;;  %v163_v23 = vld [vmem:[%s1288_s30 + $0xc8] sm:$0xff]  ;;  %v164_v24 = vld [vmem:[%s1288_s30 + $0xd0] sm:$0xff]  ;;  %v165_v29 = vld [vmem:[%s1288_s30 + $0xd8] sm:$0xff]  ;;  %s1100_s11 = scalar_lea.vmem %s1099_s5, 32768  ;;  %p1101_p8 = scmp.lt.s32.totalorder %s1556_s27, %s1099_s5 }
  0x44   : > { %v886_v59 = vadd.f32 -1.4551915e-11, %v404_v48  ;;  %v887_v0 = vadd.f32 -1.4551915e-11, %v405_v50  ;;  %v888_v1 = vadd.f32 -1.4551915e-11, %v406_v51  ;;  %v409_v3 = vmul.f32 %v281_v53, %v281_v53  ;;  %v166_v30 = vld [vmem:[%s1288_s30 + $0xe0] sm:$0xff]  ;;  %v167_v31 = vld [vmem:[%s1288_s30 + $0xe8] sm:$0xff]  ;;  %v168_v36 = vld [vmem:[%s1288_s30 + $0xf0] sm:$0xff]  ;;  %p1102_p10 = scmp.lt.s32.totalorder %s1100_s11, %s1094_s3 }
  0x45   : > { %v889_v2 = vadd.f32 -1.4551915e-11, %v407_v52  ;;  %658 = vst [vmem:[%s1311_s17 + $0x40] sm:$0xff] %v884_v57  ;;  %659 = vst [vmem:[%s1311_s17 + $0x48] sm:$0xff] %v885_v58  ;;  %v890_v5 = vadd.f32 -1.4551915e-11, %v408_v60  ;;  %v282_v6 = vmax.f32 %v154_v54, 3.8146973e-06  ;;  %v283_v7 = vmax.f32 %v155_v55, 3.8146973e-06 }
  0x46   : > { %660 = vst [vmem:[%s1311_s17 + $0x50] sm:$0xff] %v886_v59  ;;  %v284_v8 = vmax.f32 %v156_v56, 3.8146973e-06  ;;  %661 = vst [vmem:[%s1311_s17 + $0x58] sm:$0xff] %v887_v0  ;;  %v891_v10 = vadd.f32 -1.4551915e-11, %v409_v3  ;;  %v285_v11 = vmax.f32 %v157_v61, 3.8146973e-06  ;;  %v286_v12 = vmax.f32 %v158_v62, 3.8146973e-06  ;;  %p1103_p0 = por %p1102_p10, %p1101_p8 }
  0x47   : > { %662 = vst [vmem:[%s1311_s17 + $0x60] sm:$0xff] %v888_v1  ;;  %663 = vst [vmem:[%s1311_s17 + $0x68] sm:$0xff] %v889_v2  ;;  %v287_v13 = vmax.f32 %v159_v63, 3.8146973e-06  ;;  %v410_v14 = vmul.f32 %v282_v6, %v282_v6  ;;  %v411_v15 = vmul.f32 %v283_v7, %v283_v7  ;;  %v288_v17 = vmax.f32 %v160_v4, 3.8146973e-06  ;;  %v169_v41 = vld [vmem:[%s1288_s30 + $0xf8] sm:$0xff]  ;;  %v170_v54 = vld [vmem:[%s1288_s30 + $0x100] sm:$0xff] }
  0x48   : > { %664 = vst [vmem:[%s1311_s17 + $0x70] sm:$0xff] %v890_v5  ;;  %v412_v16 = vmul.f32 %v284_v8, %v284_v8  ;;  %665 = vst [vmem:[%s1311_s17 + $0x78] sm:$0xff] %v891_v10  ;;  %v413_v18 = vmul.f32 %v285_v11, %v285_v11  ;;  %v414_v19 = vmul.f32 %v286_v12, %v286_v12  ;;  %v289_v21 = vmax.f32 %v161_v9, 3.8146973e-06  ;;  %v171_v55 = vld [vmem:[%s1288_s30 + $0x108] sm:$0xff]  ;;  %v172_v56 = vld [vmem:[%s1288_s30 + $0x110] sm:$0xff]  ;;  %p1104_p2 = pnand %p1103_p0, %p1097_p13 }
  0x49   : > { %v415_v20 = vmul.f32 %v287_v13, %v287_v13  ;;  %v892_v25 = vadd.f32 -1.4551915e-11, %v410_v14  ;;  %v893_v26 = vadd.f32 -1.4551915e-11, %v411_v15  ;;  %v416_v28 = vmul.f32 %v288_v17, %v288_v17  ;;  %v173_v61 = vld [vmem:[%s1288_s30 + $0x118] sm:$0xff]  ;;  %v174_v62 = vld [vmem:[%s1288_s30 + $0x120] sm:$0xff]  ;;  %v175_v63 = vld [vmem:[%s1288_s30 + $0x128] sm:$0xff] }
  0x4a   : > { %v894_v27 = vadd.f32 -1.4551915e-11, %v412_v16  ;;  %v895_v32 = vadd.f32 -1.4551915e-11, %v413_v18  ;;  %v896_v33 = vadd.f32 -1.4551915e-11, %v414_v19  ;;  %v417_v35 = vmul.f32 %v289_v21, %v289_v21  ;;  %v176_v4 = vld [vmem:[%s1288_s30 + $0x130] sm:$0xff]  ;;  %v177_v9 = vld [vmem:[%s1288_s30 + $0x138] sm:$0xff] }
  0x4b   : > { %v897_v34 = vadd.f32 -1.4551915e-11, %v415_v20  ;;  %666 = vst [vmem:[%s1311_s17 + $0x80] sm:$0xff] %v892_v25  ;;  %667 = vst [vmem:[%s1311_s17 + $0x88] sm:$0xff] %v893_v26  ;;  %v898_v37 = vadd.f32 -1.4551915e-11, %v416_v28  ;;  %v290_v38 = vmax.f32 %v162_v22, 3.8146973e-06  ;;  %v291_v39 = vmax.f32 %v163_v23, 3.8146973e-06 }
  0x4c   : > { %668 = vst [vmem:[%s1311_s17 + $0x90] sm:$0xff] %v894_v27  ;;  %v292_v40 = vmax.f32 %v164_v24, 3.8146973e-06  ;;  %669 = vst [vmem:[%s1311_s17 + $0x98] sm:$0xff] %v895_v32  ;;  %v899_v42 = vadd.f32 -1.4551915e-11, %v417_v35  ;;  %v293_v43 = vmax.f32 %v165_v29, 3.8146973e-06  ;;  %v294_v44 = vmax.f32 %v166_v30, 3.8146973e-06 }
  0x4d   : > { %670 = vst [vmem:[%s1311_s17 + $0xa0] sm:$0xff] %v896_v33  ;;  %671 = vst [vmem:[%s1311_s17 + $0xa8] sm:$0xff] %v897_v34  ;;  %v295_v45 = vmax.f32 %v167_v31, 3.8146973e-06  ;;  %v418_v46 = vmul.f32 %v290_v38, %v290_v38  ;;  %v419_v47 = vmul.f32 %v291_v39, %v291_v39  ;;  %v296_v49 = vmax.f32 %v168_v36, 3.8146973e-06  ;;  %v178_v22 = vld [vmem:[%s1288_s30 + $0x140] sm:$0xff]  ;;  %v179_v23 = vld [vmem:[%s1288_s30 + $0x148] sm:$0xff] }
  0x4e   : > { %672 = vst [vmem:[%s1311_s17 + $0xb0] sm:$0xff] %v898_v37  ;;  %v420_v48 = vmul.f32 %v292_v40, %v292_v40  ;;  %673 = vst [vmem:[%s1311_s17 + $0xb8] sm:$0xff] %v899_v42  ;;  %v421_v50 = vmul.f32 %v293_v43, %v293_v43  ;;  %v422_v51 = vmul.f32 %v294_v44, %v294_v44  ;;  %v297_v53 = vmax.f32 %v169_v41, 3.8146973e-06  ;;  %v180_v24 = vld [vmem:[%s1288_s30 + $0x150] sm:$0xff]  ;;  %v181_v29 = vld [vmem:[%s1288_s30 + $0x158] sm:$0xff] }
  0x4f   : > { %v423_v52 = vmul.f32 %v295_v45, %v295_v45  ;;  %v900_v57 = vadd.f32 -1.4551915e-11, %v418_v46  ;;  %v901_v58 = vadd.f32 -1.4551915e-11, %v419_v47  ;;  %v424_v60 = vmul.f32 %v296_v49, %v296_v49  ;;  %v182_v30 = vld [vmem:[%s1288_s30 + $0x160] sm:$0xff]  ;;  %v183_v31 = vld [vmem:[%s1288_s30 + $0x168] sm:$0xff]  ;;  %v184_v36 = vld [vmem:[%s1288_s30 + $0x170] sm:$0xff] }
  0x50   : > { %v902_v59 = vadd.f32 -1.4551915e-11, %v420_v48  ;;  %v903_v0 = vadd.f32 -1.4551915e-11, %v421_v50  ;;  %v904_v1 = vadd.f32 -1.4551915e-11, %v422_v51  ;;  %v425_v3 = vmul.f32 %v297_v53, %v297_v53  ;;  %v185_v41 = vld [vmem:[%s1288_s30 + $0x178] sm:$0xff] }
  0x51   : > { %v905_v2 = vadd.f32 -1.4551915e-11, %v423_v52  ;;  %674 = vst [vmem:[%s1311_s17 + $0xc0] sm:$0xff] %v900_v57  ;;  %675 = vst [vmem:[%s1311_s17 + $0xc8] sm:$0xff] %v901_v58  ;;  %v906_v5 = vadd.f32 -1.4551915e-11, %v424_v60  ;;  %v298_v6 = vmax.f32 %v170_v54, 3.8146973e-06  ;;  %v299_v7 = vmax.f32 %v171_v55, 3.8146973e-06 }
  0x52   : > { %676 = vst [vmem:[%s1311_s17 + $0xd0] sm:$0xff] %v902_v59  ;;  %v300_v8 = vmax.f32 %v172_v56, 3.8146973e-06  ;;  %677 = vst [vmem:[%s1311_s17 + $0xd8] sm:$0xff] %v903_v0  ;;  %v907_v10 = vadd.f32 -1.4551915e-11, %v425_v3  ;;  %v301_v11 = vmax.f32 %v173_v61, 3.8146973e-06  ;;  %v302_v12 = vmax.f32 %v174_v62, 3.8146973e-06 }
  0x53   : > { %678 = vst [vmem:[%s1311_s17 + $0xe0] sm:$0xff] %v904_v1  ;;  %679 = vst [vmem:[%s1311_s17 + $0xe8] sm:$0xff] %v905_v2  ;;  %v303_v13 = vmax.f32 %v175_v63, 3.8146973e-06  ;;  %v426_v14 = vmul.f32 %v298_v6, %v298_v6  ;;  %v427_v15 = vmul.f32 %v299_v7, %v299_v7  ;;  %v304_v17 = vmax.f32 %v176_v4, 3.8146973e-06  ;;  %v186_v54 = vld [vmem:[%s1288_s30 + $0x180] sm:$0xff]  ;;  %v187_v55 = vld [vmem:[%s1288_s30 + $0x188] sm:$0xff] }
  0x54   : > { %680 = vst [vmem:[%s1311_s17 + $0xf0] sm:$0xff] %v906_v5  ;;  %v428_v16 = vmul.f32 %v300_v8, %v300_v8  ;;  %681 = vst [vmem:[%s1311_s17 + $0xf8] sm:$0xff] %v907_v10  ;;  %v429_v18 = vmul.f32 %v301_v11, %v301_v11  ;;  %v430_v19 = vmul.f32 %v302_v12, %v302_v12  ;;  %v305_v21 = vmax.f32 %v177_v9, 3.8146973e-06  ;;  %v188_v56 = vld [vmem:[%s1288_s30 + $0x190] sm:$0xff]  ;;  %v189_v61 = vld [vmem:[%s1288_s30 + $0x198] sm:$0xff] }
  0x55   : > { %v431_v20 = vmul.f32 %v303_v13, %v303_v13  ;;  %v908_v25 = vadd.f32 -1.4551915e-11, %v426_v14  ;;  %v909_v26 = vadd.f32 -1.4551915e-11, %v427_v15  ;;  %v432_v28 = vmul.f32 %v304_v17, %v304_v17  ;;  %v190_v62 = vld [vmem:[%s1288_s30 + $0x1a0] sm:$0xff]  ;;  %v191_v63 = vld [vmem:[%s1288_s30 + $0x1a8] sm:$0xff]  ;;  %v192_v4 = vld [vmem:[%s1288_s30 + $0x1b0] sm:$0xff] }
  0x56   : > { %v910_v27 = vadd.f32 -1.4551915e-11, %v428_v16  ;;  %v911_v32 = vadd.f32 -1.4551915e-11, %v429_v18  ;;  %v912_v33 = vadd.f32 -1.4551915e-11, %v430_v19  ;;  %v433_v35 = vmul.f32 %v305_v21, %v305_v21  ;;  %v193_v9 = vld [vmem:[%s1288_s30 + $0x1b8] sm:$0xff] }
  0x57   : > { %v913_v34 = vadd.f32 -1.4551915e-11, %v431_v20  ;;  %682 = vst [vmem:[%s1311_s17 + $0x100] sm:$0xff] %v908_v25  ;;  %683 = vst [vmem:[%s1311_s17 + $0x108] sm:$0xff] %v909_v26  ;;  %v914_v37 = vadd.f32 -1.4551915e-11, %v432_v28  ;;  %v306_v38 = vmax.f32 %v178_v22, 3.8146973e-06  ;;  %v307_v39 = vmax.f32 %v179_v23, 3.8146973e-06 }
  0x58   : > { %684 = vst [vmem:[%s1311_s17 + $0x110] sm:$0xff] %v910_v27  ;;  %v308_v40 = vmax.f32 %v180_v24, 3.8146973e-06  ;;  %685 = vst [vmem:[%s1311_s17 + $0x118] sm:$0xff] %v911_v32  ;;  %v915_v42 = vadd.f32 -1.4551915e-11, %v433_v35  ;;  %v309_v43 = vmax.f32 %v181_v29, 3.8146973e-06  ;;  %v310_v44 = vmax.f32 %v182_v30, 3.8146973e-06 }
  0x59   : > { %686 = vst [vmem:[%s1311_s17 + $0x120] sm:$0xff] %v912_v33  ;;  %687 = vst [vmem:[%s1311_s17 + $0x128] sm:$0xff] %v913_v34  ;;  %v311_v45 = vmax.f32 %v183_v31, 3.8146973e-06  ;;  %v434_v46 = vmul.f32 %v306_v38, %v306_v38  ;;  %v435_v47 = vmul.f32 %v307_v39, %v307_v39  ;;  %v312_v49 = vmax.f32 %v184_v36, 3.8146973e-06  ;;  %v194_v22 = vld [vmem:[%s1288_s30 + $0x1c0] sm:$0xff]  ;;  %v195_v23 = vld [vmem:[%s1288_s30 + $0x1c8] sm:$0xff] }
  0x5a   : > { %688 = vst [vmem:[%s1311_s17 + $0x130] sm:$0xff] %v914_v37  ;;  %v436_v48 = vmul.f32 %v308_v40, %v308_v40  ;;  %689 = vst [vmem:[%s1311_s17 + $0x138] sm:$0xff] %v915_v42  ;;  %v437_v50 = vmul.f32 %v309_v43, %v309_v43  ;;  %v438_v51 = vmul.f32 %v310_v44, %v310_v44  ;;  %v313_v53 = vmax.f32 %v185_v41, 3.8146973e-06  ;;  %v196_v24 = vld [vmem:[%s1288_s30 + $0x1d0] sm:$0xff]  ;;  %v197_v29 = vld [vmem:[%s1288_s30 + $0x1d8] sm:$0xff] }
  0x5b   : > { %v439_v52 = vmul.f32 %v311_v45, %v311_v45  ;;  %v916_v57 = vadd.f32 -1.4551915e-11, %v434_v46  ;;  %v917_v58 = vadd.f32 -1.4551915e-11, %v435_v47  ;;  %v440_v60 = vmul.f32 %v312_v49, %v312_v49  ;;  %v198_v30 = vld [vmem:[%s1288_s30 + $0x1e0] sm:$0xff]  ;;  %v199_v31 = vld [vmem:[%s1288_s30 + $0x1e8] sm:$0xff]  ;;  %v200_v36 = vld [vmem:[%s1288_s30 + $0x1f0] sm:$0xff] }
  0x5c   : > { %v918_v59 = vadd.f32 -1.4551915e-11, %v436_v48  ;;  %v919_v0 = vadd.f32 -1.4551915e-11, %v437_v50  ;;  %v920_v1 = vadd.f32 -1.4551915e-11, %v438_v51  ;;  %v441_v3 = vmul.f32 %v313_v53, %v313_v53  ;;  %v201_v41 = vld [vmem:[%s1288_s30 + $0x1f8] sm:$0xff] }
  0x5d   : > { %v921_v2 = vadd.f32 -1.4551915e-11, %v439_v52  ;;  %690 = vst [vmem:[%s1311_s17 + $0x140] sm:$0xff] %v916_v57  ;;  %691 = vst [vmem:[%s1311_s17 + $0x148] sm:$0xff] %v917_v58  ;;  %v922_v5 = vadd.f32 -1.4551915e-11, %v440_v60  ;;  %v314_v6 = vmax.f32 %v186_v54, 3.8146973e-06  ;;  %v315_v7 = vmax.f32 %v187_v55, 3.8146973e-06 }
  0x5e   : > { %692 = vst [vmem:[%s1311_s17 + $0x150] sm:$0xff] %v918_v59  ;;  %v316_v8 = vmax.f32 %v188_v56, 3.8146973e-06  ;;  %693 = vst [vmem:[%s1311_s17 + $0x158] sm:$0xff] %v919_v0  ;;  %v923_v10 = vadd.f32 -1.4551915e-11, %v441_v3  ;;  %v317_v11 = vmax.f32 %v189_v61, 3.8146973e-06  ;;  %v318_v12 = vmax.f32 %v190_v62, 3.8146973e-06 }
  0x5f   : > { %694 = vst [vmem:[%s1311_s17 + $0x160] sm:$0xff] %v920_v1  ;;  %695 = vst [vmem:[%s1311_s17 + $0x168] sm:$0xff] %v921_v2  ;;  %v319_v13 = vmax.f32 %v191_v63, 3.8146973e-06  ;;  %v442_v14 = vmul.f32 %v314_v6, %v314_v6  ;;  %v443_v15 = vmul.f32 %v315_v7, %v315_v7  ;;  %v320_v17 = vmax.f32 %v192_v4, 3.8146973e-06  ;;  %v202_v54 = vld [vmem:[%s1288_s30 + $0x200] sm:$0xff]  ;;  %v203_v55 = vld [vmem:[%s1288_s30 + $0x208] sm:$0xff] }
  0x60   : > { %696 = vst [vmem:[%s1311_s17 + $0x170] sm:$0xff] %v922_v5  ;;  %v444_v16 = vmul.f32 %v316_v8, %v316_v8  ;;  %697 = vst [vmem:[%s1311_s17 + $0x178] sm:$0xff] %v923_v10  ;;  %v445_v18 = vmul.f32 %v317_v11, %v317_v11  ;;  %v446_v19 = vmul.f32 %v318_v12, %v318_v12  ;;  %v321_v21 = vmax.f32 %v193_v9, 3.8146973e-06  ;;  %v204_v56 = vld [vmem:[%s1288_s30 + $0x210] sm:$0xff]  ;;  %v205_v61 = vld [vmem:[%s1288_s30 + $0x218] sm:$0xff] }
  0x61   : > { %v447_v20 = vmul.f32 %v319_v13, %v319_v13  ;;  %v924_v25 = vadd.f32 -1.4551915e-11, %v442_v14  ;;  %v925_v26 = vadd.f32 -1.4551915e-11, %v443_v15  ;;  %v448_v28 = vmul.f32 %v320_v17, %v320_v17  ;;  %v206_v62 = vld [vmem:[%s1288_s30 + $0x220] sm:$0xff]  ;;  %v207_v63 = vld [vmem:[%s1288_s30 + $0x228] sm:$0xff]  ;;  %v208_v4 = vld [vmem:[%s1288_s30 + $0x230] sm:$0xff] }
  0x62   : > { %v926_v27 = vadd.f32 -1.4551915e-11, %v444_v16  ;;  %v927_v32 = vadd.f32 -1.4551915e-11, %v445_v18  ;;  %v928_v33 = vadd.f32 -1.4551915e-11, %v446_v19  ;;  %v449_v35 = vmul.f32 %v321_v21, %v321_v21  ;;  %v209_v9 = vld [vmem:[%s1288_s30 + $0x238] sm:$0xff] }
  0x63   : > { %v929_v34 = vadd.f32 -1.4551915e-11, %v447_v20  ;;  %698 = vst [vmem:[%s1311_s17 + $0x180] sm:$0xff] %v924_v25  ;;  %699 = vst [vmem:[%s1311_s17 + $0x188] sm:$0xff] %v925_v26  ;;  %v930_v37 = vadd.f32 -1.4551915e-11, %v448_v28  ;;  %v322_v38 = vmax.f32 %v194_v22, 3.8146973e-06  ;;  %v323_v39 = vmax.f32 %v195_v23, 3.8146973e-06 }
  0x64   : > { %700 = vst [vmem:[%s1311_s17 + $0x190] sm:$0xff] %v926_v27  ;;  %v324_v40 = vmax.f32 %v196_v24, 3.8146973e-06  ;;  %701 = vst [vmem:[%s1311_s17 + $0x198] sm:$0xff] %v927_v32  ;;  %v931_v42 = vadd.f32 -1.4551915e-11, %v449_v35  ;;  %v325_v43 = vmax.f32 %v197_v29, 3.8146973e-06  ;;  %v326_v44 = vmax.f32 %v198_v30, 3.8146973e-06 }
  0x65   : > { %702 = vst [vmem:[%s1311_s17 + $0x1a0] sm:$0xff] %v928_v33  ;;  %703 = vst [vmem:[%s1311_s17 + $0x1a8] sm:$0xff] %v929_v34  ;;  %v327_v45 = vmax.f32 %v199_v31, 3.8146973e-06  ;;  %v450_v46 = vmul.f32 %v322_v38, %v322_v38  ;;  %v451_v47 = vmul.f32 %v323_v39, %v323_v39  ;;  %v328_v49 = vmax.f32 %v200_v36, 3.8146973e-06  ;;  %v210_v22 = vld [vmem:[%s1288_s30 + $0x240] sm:$0xff]  ;;  %v211_v23 = vld [vmem:[%s1288_s30 + $0x248] sm:$0xff] }
  0x66   : > { %704 = vst [vmem:[%s1311_s17 + $0x1b0] sm:$0xff] %v930_v37  ;;  %v452_v48 = vmul.f32 %v324_v40, %v324_v40  ;;  %705 = vst [vmem:[%s1311_s17 + $0x1b8] sm:$0xff] %v931_v42  ;;  %v453_v50 = vmul.f32 %v325_v43, %v325_v43  ;;  %v454_v51 = vmul.f32 %v326_v44, %v326_v44  ;;  %v329_v53 = vmax.f32 %v201_v41, 3.8146973e-06  ;;  %v212_v24 = vld [vmem:[%s1288_s30 + $0x250] sm:$0xff]  ;;  %v213_v29 = vld [vmem:[%s1288_s30 + $0x258] sm:$0xff] }
  0x67   : > { %v455_v52 = vmul.f32 %v327_v45, %v327_v45  ;;  %v932_v57 = vadd.f32 -1.4551915e-11, %v450_v46  ;;  %v933_v58 = vadd.f32 -1.4551915e-11, %v451_v47  ;;  %v456_v60 = vmul.f32 %v328_v49, %v328_v49  ;;  %v214_v30 = vld [vmem:[%s1288_s30 + $0x260] sm:$0xff]  ;;  %v215_v31 = vld [vmem:[%s1288_s30 + $0x268] sm:$0xff]  ;;  %v216_v36 = vld [vmem:[%s1288_s30 + $0x270] sm:$0xff] }
  0x68   : > { %v934_v59 = vadd.f32 -1.4551915e-11, %v452_v48  ;;  %v935_v0 = vadd.f32 -1.4551915e-11, %v453_v50  ;;  %v936_v1 = vadd.f32 -1.4551915e-11, %v454_v51  ;;  %v457_v3 = vmul.f32 %v329_v53, %v329_v53  ;;  %v217_v41 = vld [vmem:[%s1288_s30 + $0x278] sm:$0xff] }
  0x69   : > { %v937_v2 = vadd.f32 -1.4551915e-11, %v455_v52  ;;  %706 = vst [vmem:[%s1311_s17 + $0x1c0] sm:$0xff] %v932_v57  ;;  %707 = vst [vmem:[%s1311_s17 + $0x1c8] sm:$0xff] %v933_v58  ;;  %v938_v5 = vadd.f32 -1.4551915e-11, %v456_v60  ;;  %v330_v6 = vmax.f32 %v202_v54, 3.8146973e-06  ;;  %v331_v7 = vmax.f32 %v203_v55, 3.8146973e-06 }
  0x6a   : > { %708 = vst [vmem:[%s1311_s17 + $0x1d0] sm:$0xff] %v934_v59  ;;  %v332_v8 = vmax.f32 %v204_v56, 3.8146973e-06  ;;  %709 = vst [vmem:[%s1311_s17 + $0x1d8] sm:$0xff] %v935_v0  ;;  %v939_v10 = vadd.f32 -1.4551915e-11, %v457_v3  ;;  %v333_v11 = vmax.f32 %v205_v61, 3.8146973e-06  ;;  %v334_v12 = vmax.f32 %v206_v62, 3.8146973e-06 }
  0x6b   : > { %710 = vst [vmem:[%s1311_s17 + $0x1e0] sm:$0xff] %v936_v1  ;;  %711 = vst [vmem:[%s1311_s17 + $0x1e8] sm:$0xff] %v937_v2  ;;  %v335_v13 = vmax.f32 %v207_v63, 3.8146973e-06  ;;  %v458_v14 = vmul.f32 %v330_v6, %v330_v6  ;;  %v459_v15 = vmul.f32 %v331_v7, %v331_v7  ;;  %v336_v17 = vmax.f32 %v208_v4, 3.8146973e-06  ;;  %v218_v54 = vld [vmem:[%s1288_s30 + $0x280] sm:$0xff]  ;;  %v219_v55 = vld [vmem:[%s1288_s30 + $0x288] sm:$0xff] }
  0x6c   : > { %712 = vst [vmem:[%s1311_s17 + $0x1f0] sm:$0xff] %v938_v5  ;;  %v460_v16 = vmul.f32 %v332_v8, %v332_v8  ;;  %713 = vst [vmem:[%s1311_s17 + $0x1f8] sm:$0xff] %v939_v10  ;;  %v461_v18 = vmul.f32 %v333_v11, %v333_v11  ;;  %v462_v19 = vmul.f32 %v334_v12, %v334_v12  ;;  %v337_v21 = vmax.f32 %v209_v9, 3.8146973e-06  ;;  %v220_v56 = vld [vmem:[%s1288_s30 + $0x290] sm:$0xff]  ;;  %v221_v61 = vld [vmem:[%s1288_s30 + $0x298] sm:$0xff] }
  0x6d   : > { %v463_v20 = vmul.f32 %v335_v13, %v335_v13  ;;  %v940_v25 = vadd.f32 -1.4551915e-11, %v458_v14  ;;  %v941_v26 = vadd.f32 -1.4551915e-11, %v459_v15  ;;  %v464_v28 = vmul.f32 %v336_v17, %v336_v17  ;;  %v222_v62 = vld [vmem:[%s1288_s30 + $0x2a0] sm:$0xff]  ;;  %v223_v63 = vld [vmem:[%s1288_s30 + $0x2a8] sm:$0xff]  ;;  %v224_v4 = vld [vmem:[%s1288_s30 + $0x2b0] sm:$0xff] }
  0x6e   : > { %v942_v27 = vadd.f32 -1.4551915e-11, %v460_v16  ;;  %v943_v32 = vadd.f32 -1.4551915e-11, %v461_v18  ;;  %v944_v33 = vadd.f32 -1.4551915e-11, %v462_v19  ;;  %v465_v35 = vmul.f32 %v337_v21, %v337_v21  ;;  %v225_v9 = vld [vmem:[%s1288_s30 + $0x2b8] sm:$0xff] }
  0x6f   : > { %v945_v34 = vadd.f32 -1.4551915e-11, %v463_v20  ;;  %714 = vst [vmem:[%s1311_s17 + $0x200] sm:$0xff] %v940_v25  ;;  %715 = vst [vmem:[%s1311_s17 + $0x208] sm:$0xff] %v941_v26  ;;  %v946_v37 = vadd.f32 -1.4551915e-11, %v464_v28  ;;  %v338_v38 = vmax.f32 %v210_v22, 3.8146973e-06  ;;  %v339_v39 = vmax.f32 %v211_v23, 3.8146973e-06 }
  0x70   : > { %716 = vst [vmem:[%s1311_s17 + $0x210] sm:$0xff] %v942_v27  ;;  %v340_v40 = vmax.f32 %v212_v24, 3.8146973e-06  ;;  %717 = vst [vmem:[%s1311_s17 + $0x218] sm:$0xff] %v943_v32  ;;  %v947_v42 = vadd.f32 -1.4551915e-11, %v465_v35  ;;  %v341_v43 = vmax.f32 %v213_v29, 3.8146973e-06  ;;  %v342_v44 = vmax.f32 %v214_v30, 3.8146973e-06 }
  0x71   : > { %718 = vst [vmem:[%s1311_s17 + $0x220] sm:$0xff] %v944_v33  ;;  %719 = vst [vmem:[%s1311_s17 + $0x228] sm:$0xff] %v945_v34  ;;  %v343_v45 = vmax.f32 %v215_v31, 3.8146973e-06  ;;  %v466_v46 = vmul.f32 %v338_v38, %v338_v38  ;;  %v467_v47 = vmul.f32 %v339_v39, %v339_v39  ;;  %v344_v49 = vmax.f32 %v216_v36, 3.8146973e-06  ;;  %v226_v22 = vld [vmem:[%s1288_s30 + $0x2c0] sm:$0xff]  ;;  %v227_v23 = vld [vmem:[%s1288_s30 + $0x2c8] sm:$0xff] }
  0x72   : > { %720 = vst [vmem:[%s1311_s17 + $0x230] sm:$0xff] %v946_v37  ;;  %v468_v48 = vmul.f32 %v340_v40, %v340_v40  ;;  %721 = vst [vmem:[%s1311_s17 + $0x238] sm:$0xff] %v947_v42  ;;  %v469_v50 = vmul.f32 %v341_v43, %v341_v43  ;;  %v470_v51 = vmul.f32 %v342_v44, %v342_v44  ;;  %v345_v53 = vmax.f32 %v217_v41, 3.8146973e-06  ;;  %v228_v24 = vld [vmem:[%s1288_s30 + $0x2d0] sm:$0xff]  ;;  %v229_v29 = vld [vmem:[%s1288_s30 + $0x2d8] sm:$0xff] }
  0x73   : > { %v471_v52 = vmul.f32 %v343_v45, %v343_v45  ;;  %v948_v57 = vadd.f32 -1.4551915e-11, %v466_v46  ;;  %v949_v58 = vadd.f32 -1.4551915e-11, %v467_v47  ;;  %v472_v60 = vmul.f32 %v344_v49, %v344_v49  ;;  %v230_v30 = vld [vmem:[%s1288_s30 + $0x2e0] sm:$0xff]  ;;  %v231_v31 = vld [vmem:[%s1288_s30 + $0x2e8] sm:$0xff]  ;;  %v232_v36 = vld [vmem:[%s1288_s30 + $0x2f0] sm:$0xff] }
  0x74   : > { %v950_v59 = vadd.f32 -1.4551915e-11, %v468_v48  ;;  %v951_v0 = vadd.f32 -1.4551915e-11, %v469_v50  ;;  %v952_v1 = vadd.f32 -1.4551915e-11, %v470_v51  ;;  %v473_v3 = vmul.f32 %v345_v53, %v345_v53  ;;  %v233_v41 = vld [vmem:[%s1288_s30 + $0x2f8] sm:$0xff] }
  0x75   : > { %v953_v2 = vadd.f32 -1.4551915e-11, %v471_v52  ;;  %722 = vst [vmem:[%s1311_s17 + $0x240] sm:$0xff] %v948_v57  ;;  %723 = vst [vmem:[%s1311_s17 + $0x248] sm:$0xff] %v949_v58  ;;  %v954_v5 = vadd.f32 -1.4551915e-11, %v472_v60  ;;  %v346_v6 = vmax.f32 %v218_v54, 3.8146973e-06  ;;  %v347_v7 = vmax.f32 %v219_v55, 3.8146973e-06 }
  0x76   : > { %724 = vst [vmem:[%s1311_s17 + $0x250] sm:$0xff] %v950_v59  ;;  %v348_v8 = vmax.f32 %v220_v56, 3.8146973e-06  ;;  %725 = vst [vmem:[%s1311_s17 + $0x258] sm:$0xff] %v951_v0  ;;  %v955_v10 = vadd.f32 -1.4551915e-11, %v473_v3  ;;  %v349_v11 = vmax.f32 %v221_v61, 3.8146973e-06  ;;  %v350_v12 = vmax.f32 %v222_v62, 3.8146973e-06 }
  0x77   : > { %726 = vst [vmem:[%s1311_s17 + $0x260] sm:$0xff] %v952_v1  ;;  %727 = vst [vmem:[%s1311_s17 + $0x268] sm:$0xff] %v953_v2  ;;  %v351_v13 = vmax.f32 %v223_v63, 3.8146973e-06  ;;  %v474_v14 = vmul.f32 %v346_v6, %v346_v6  ;;  %v475_v15 = vmul.f32 %v347_v7, %v347_v7  ;;  %v352_v17 = vmax.f32 %v224_v4, 3.8146973e-06  ;;  %v234_v54 = vld [vmem:[%s1288_s30 + $0x300] sm:$0xff]  ;;  %v235_v55 = vld [vmem:[%s1288_s30 + $0x308] sm:$0xff] }
  0x78   : > { %728 = vst [vmem:[%s1311_s17 + $0x270] sm:$0xff] %v954_v5  ;;  %v476_v16 = vmul.f32 %v348_v8, %v348_v8  ;;  %729 = vst [vmem:[%s1311_s17 + $0x278] sm:$0xff] %v955_v10  ;;  %v477_v18 = vmul.f32 %v349_v11, %v349_v11  ;;  %v478_v19 = vmul.f32 %v350_v12, %v350_v12  ;;  %v353_v21 = vmax.f32 %v225_v9, 3.8146973e-06  ;;  %v236_v56 = vld [vmem:[%s1288_s30 + $0x310] sm:$0xff]  ;;  %v237_v61 = vld [vmem:[%s1288_s30 + $0x318] sm:$0xff] }
  0x79   : > { %v479_v20 = vmul.f32 %v351_v13, %v351_v13  ;;  %v956_v25 = vadd.f32 -1.4551915e-11, %v474_v14  ;;  %v957_v26 = vadd.f32 -1.4551915e-11, %v475_v15  ;;  %v480_v28 = vmul.f32 %v352_v17, %v352_v17  ;;  %v238_v62 = vld [vmem:[%s1288_s30 + $0x320] sm:$0xff]  ;;  %v239_v63 = vld [vmem:[%s1288_s30 + $0x328] sm:$0xff]  ;;  %v240_v4 = vld [vmem:[%s1288_s30 + $0x330] sm:$0xff] }
  0x7a   : > { %v958_v27 = vadd.f32 -1.4551915e-11, %v476_v16  ;;  %v959_v32 = vadd.f32 -1.4551915e-11, %v477_v18  ;;  %v960_v33 = vadd.f32 -1.4551915e-11, %v478_v19  ;;  %v481_v35 = vmul.f32 %v353_v21, %v353_v21  ;;  %v241_v9 = vld [vmem:[%s1288_s30 + $0x338] sm:$0xff] }
  0x7b   : > { %v961_v34 = vadd.f32 -1.4551915e-11, %v479_v20  ;;  %730 = vst [vmem:[%s1311_s17 + $0x280] sm:$0xff] %v956_v25  ;;  %731 = vst [vmem:[%s1311_s17 + $0x288] sm:$0xff] %v957_v26  ;;  %v962_v37 = vadd.f32 -1.4551915e-11, %v480_v28  ;;  %v354_v38 = vmax.f32 %v226_v22, 3.8146973e-06  ;;  %v355_v39 = vmax.f32 %v227_v23, 3.8146973e-06 }
  0x7c   : > { %732 = vst [vmem:[%s1311_s17 + $0x290] sm:$0xff] %v958_v27  ;;  %v356_v40 = vmax.f32 %v228_v24, 3.8146973e-06  ;;  %733 = vst [vmem:[%s1311_s17 + $0x298] sm:$0xff] %v959_v32  ;;  %v963_v42 = vadd.f32 -1.4551915e-11, %v481_v35  ;;  %v357_v43 = vmax.f32 %v229_v29, 3.8146973e-06  ;;  %v358_v44 = vmax.f32 %v230_v30, 3.8146973e-06 }
  0x7d   : > { %734 = vst [vmem:[%s1311_s17 + $0x2a0] sm:$0xff] %v960_v33  ;;  %735 = vst [vmem:[%s1311_s17 + $0x2a8] sm:$0xff] %v961_v34  ;;  %v359_v45 = vmax.f32 %v231_v31, 3.8146973e-06  ;;  %v482_v46 = vmul.f32 %v354_v38, %v354_v38  ;;  %v483_v47 = vmul.f32 %v355_v39, %v355_v39  ;;  %v360_v49 = vmax.f32 %v232_v36, 3.8146973e-06  ;;  %v242_v22 = vld [vmem:[%s1288_s30 + $0x340] sm:$0xff]  ;;  %v243_v23 = vld [vmem:[%s1288_s30 + $0x348] sm:$0xff] }
  0x7e   : > { %736 = vst [vmem:[%s1311_s17 + $0x2b0] sm:$0xff] %v962_v37  ;;  %v484_v48 = vmul.f32 %v356_v40, %v356_v40  ;;  %737 = vst [vmem:[%s1311_s17 + $0x2b8] sm:$0xff] %v963_v42  ;;  %v485_v50 = vmul.f32 %v357_v43, %v357_v43  ;;  %v486_v51 = vmul.f32 %v358_v44, %v358_v44  ;;  %v361_v53 = vmax.f32 %v233_v41, 3.8146973e-06  ;;  %v244_v24 = vld [vmem:[%s1288_s30 + $0x350] sm:$0xff]  ;;  %v245_v29 = vld [vmem:[%s1288_s30 + $0x358] sm:$0xff] }
  0x7f   : > { %v487_v52 = vmul.f32 %v359_v45, %v359_v45  ;;  %v964_v57 = vadd.f32 -1.4551915e-11, %v482_v46  ;;  %v965_v58 = vadd.f32 -1.4551915e-11, %v483_v47  ;;  %v488_v60 = vmul.f32 %v360_v49, %v360_v49  ;;  %v246_v30 = vld [vmem:[%s1288_s30 + $0x360] sm:$0xff]  ;;  %v247_v31 = vld [vmem:[%s1288_s30 + $0x368] sm:$0xff]  ;;  %v248_v36 = vld [vmem:[%s1288_s30 + $0x370] sm:$0xff] }
  0x80   : > { %v966_v59 = vadd.f32 -1.4551915e-11, %v484_v48  ;;  %v967_v0 = vadd.f32 -1.4551915e-11, %v485_v50  ;;  %v968_v1 = vadd.f32 -1.4551915e-11, %v486_v51  ;;  %v489_v3 = vmul.f32 %v361_v53, %v361_v53  ;;  %v249_v41 = vld [vmem:[%s1288_s30 + $0x378] sm:$0xff] }
  0x81   : > { %v969_v2 = vadd.f32 -1.4551915e-11, %v487_v52  ;;  %738 = vst [vmem:[%s1311_s17 + $0x2c0] sm:$0xff] %v964_v57  ;;  %739 = vst [vmem:[%s1311_s17 + $0x2c8] sm:$0xff] %v965_v58  ;;  %v970_v5 = vadd.f32 -1.4551915e-11, %v488_v60  ;;  %v362_v6 = vmax.f32 %v234_v54, 3.8146973e-06  ;;  %v363_v7 = vmax.f32 %v235_v55, 3.8146973e-06 }
  0x82   : > { %740 = vst [vmem:[%s1311_s17 + $0x2d0] sm:$0xff] %v966_v59  ;;  %v364_v8 = vmax.f32 %v236_v56, 3.8146973e-06  ;;  %741 = vst [vmem:[%s1311_s17 + $0x2d8] sm:$0xff] %v967_v0  ;;  %v971_v10 = vadd.f32 -1.4551915e-11, %v489_v3  ;;  %v365_v11 = vmax.f32 %v237_v61, 3.8146973e-06  ;;  %v366_v12 = vmax.f32 %v238_v62, 3.8146973e-06 }
  0x83   : > { %742 = vst [vmem:[%s1311_s17 + $0x2e0] sm:$0xff] %v968_v1  ;;  %743 = vst [vmem:[%s1311_s17 + $0x2e8] sm:$0xff] %v969_v2  ;;  %v367_v13 = vmax.f32 %v239_v63, 3.8146973e-06  ;;  %v490_v14 = vmul.f32 %v362_v6, %v362_v6  ;;  %v491_v15 = vmul.f32 %v363_v7, %v363_v7  ;;  %v368_v17 = vmax.f32 %v240_v4, 3.8146973e-06  ;;  %v250_v54 = vld [vmem:[%s1288_s30 + $0x380] sm:$0xff]  ;;  %v251_v55 = vld [vmem:[%s1288_s30 + $0x388] sm:$0xff] }
  0x84   : > { %744 = vst [vmem:[%s1311_s17 + $0x2f0] sm:$0xff] %v970_v5  ;;  %v492_v16 = vmul.f32 %v364_v8, %v364_v8  ;;  %745 = vst [vmem:[%s1311_s17 + $0x2f8] sm:$0xff] %v971_v10  ;;  %v493_v18 = vmul.f32 %v365_v11, %v365_v11  ;;  %v494_v19 = vmul.f32 %v366_v12, %v366_v12  ;;  %v369_v21 = vmax.f32 %v241_v9, 3.8146973e-06  ;;  %v252_v56 = vld [vmem:[%s1288_s30 + $0x390] sm:$0xff]  ;;  %v253_v61 = vld [vmem:[%s1288_s30 + $0x398] sm:$0xff] }
  0x85   : > { %v495_v20 = vmul.f32 %v367_v13, %v367_v13  ;;  %v972_v25 = vadd.f32 -1.4551915e-11, %v490_v14  ;;  %v973_v26 = vadd.f32 -1.4551915e-11, %v491_v15  ;;  %v496_v28 = vmul.f32 %v368_v17, %v368_v17  ;;  %v254_v62 = vld [vmem:[%s1288_s30 + $0x3a0] sm:$0xff]  ;;  %v255_v63 = vld [vmem:[%s1288_s30 + $0x3a8] sm:$0xff]  ;;  %v256_v4 = vld [vmem:[%s1288_s30 + $0x3b0] sm:$0xff] }
  0x86   : > { %v974_v27 = vadd.f32 -1.4551915e-11, %v492_v16  ;;  %v975_v32 = vadd.f32 -1.4551915e-11, %v493_v18  ;;  %v976_v33 = vadd.f32 -1.4551915e-11, %v494_v19  ;;  %v497_v35 = vmul.f32 %v369_v21, %v369_v21  ;;  %v257_v9 = vld [vmem:[%s1288_s30 + $0x3b8] sm:$0xff] }
  0x87   : > { %v977_v34 = vadd.f32 -1.4551915e-11, %v495_v20  ;;  %746 = vst [vmem:[%s1311_s17 + $0x300] sm:$0xff] %v972_v25  ;;  %747 = vst [vmem:[%s1311_s17 + $0x308] sm:$0xff] %v973_v26  ;;  %v978_v37 = vadd.f32 -1.4551915e-11, %v496_v28  ;;  %v370_v38 = vmax.f32 %v242_v22, 3.8146973e-06  ;;  %v371_v39 = vmax.f32 %v243_v23, 3.8146973e-06 }
  0x88   : > { %748 = vst [vmem:[%s1311_s17 + $0x310] sm:$0xff] %v974_v27  ;;  %v372_v40 = vmax.f32 %v244_v24, 3.8146973e-06  ;;  %749 = vst [vmem:[%s1311_s17 + $0x318] sm:$0xff] %v975_v32  ;;  %v979_v42 = vadd.f32 -1.4551915e-11, %v497_v35  ;;  %v373_v43 = vmax.f32 %v245_v29, 3.8146973e-06  ;;  %v374_v44 = vmax.f32 %v246_v30, 3.8146973e-06 }
  0x89   : > { %750 = vst [vmem:[%s1311_s17 + $0x320] sm:$0xff] %v976_v33  ;;  %751 = vst [vmem:[%s1311_s17 + $0x328] sm:$0xff] %v977_v34  ;;  %v375_v45 = vmax.f32 %v247_v31, 3.8146973e-06  ;;  %v498_v46 = vmul.f32 %v370_v38, %v370_v38  ;;  %v499_v47 = vmul.f32 %v371_v39, %v371_v39  ;;  %v376_v49 = vmax.f32 %v248_v36, 3.8146973e-06  ;;  %v258_v22 = vld [vmem:[%s1288_s30 + $0x3c0] sm:$0xff]  ;;  %v259_v23 = vld [vmem:[%s1288_s30 + $0x3c8] sm:$0xff] }
  0x8a   : > { %752 = vst [vmem:[%s1311_s17 + $0x330] sm:$0xff] %v978_v37  ;;  %v500_v48 = vmul.f32 %v372_v40, %v372_v40  ;;  %753 = vst [vmem:[%s1311_s17 + $0x338] sm:$0xff] %v979_v42  ;;  %v501_v50 = vmul.f32 %v373_v43, %v373_v43  ;;  %v502_v51 = vmul.f32 %v374_v44, %v374_v44  ;;  %v377_v53 = vmax.f32 %v249_v41, 3.8146973e-06  ;;  %v260_v24 = vld [vmem:[%s1288_s30 + $0x3d0] sm:$0xff]  ;;  %v261_v29 = vld [vmem:[%s1288_s30 + $0x3d8] sm:$0xff] }
  0x8b   : > { %v503_v52 = vmul.f32 %v375_v45, %v375_v45  ;;  %v980_v57 = vadd.f32 -1.4551915e-11, %v498_v46  ;;  %v981_v58 = vadd.f32 -1.4551915e-11, %v499_v47  ;;  %v504_v60 = vmul.f32 %v376_v49, %v376_v49  ;;  %v262_v30 = vld [vmem:[%s1288_s30 + $0x3e0] sm:$0xff]  ;;  %v263_v31 = vld [vmem:[%s1288_s30 + $0x3e8] sm:$0xff]  ;;  %v264_v36 = vld [vmem:[%s1288_s30 + $0x3f0] sm:$0xff] }
  0x8c   : > { %v982_v59 = vadd.f32 -1.4551915e-11, %v500_v48  ;;  %v983_v0 = vadd.f32 -1.4551915e-11, %v501_v50  ;;  %v984_v1 = vadd.f32 -1.4551915e-11, %v502_v51  ;;  %v505_v3 = vmul.f32 %v377_v53, %v377_v53  ;;  %v265_v41 = vld [vmem:[%s1288_s30 + $0x3f8] sm:$0xff] }
  0x8d   : > { %v985_v2 = vadd.f32 -1.4551915e-11, %v503_v52  ;;  %754 = vst [vmem:[%s1311_s17 + $0x340] sm:$0xff] %v980_v57  ;;  %755 = vst [vmem:[%s1311_s17 + $0x348] sm:$0xff] %v981_v58  ;;  %v986_v5 = vadd.f32 -1.4551915e-11, %v504_v60  ;;  %v378_v6 = vmax.f32 %v250_v54, 3.8146973e-06  ;;  %v379_v7 = vmax.f32 %v251_v55, 3.8146973e-06 }
  0x8e   : > { %756 = vst [vmem:[%s1311_s17 + $0x350] sm:$0xff] %v982_v59  ;;  %v380_v8 = vmax.f32 %v252_v56, 3.8146973e-06  ;;  %757 = vst [vmem:[%s1311_s17 + $0x358] sm:$0xff] %v983_v0  ;;  %v987_v10 = vadd.f32 -1.4551915e-11, %v505_v3  ;;  %v381_v11 = vmax.f32 %v253_v61, 3.8146973e-06  ;;  %v382_v12 = vmax.f32 %v254_v62, 3.8146973e-06 }
  0x8f   : > { %758 = vst [vmem:[%s1311_s17 + $0x360] sm:$0xff] %v984_v1  ;;  %759 = vst [vmem:[%s1311_s17 + $0x368] sm:$0xff] %v985_v2  ;;  %v383_v13 = vmax.f32 %v255_v63, 3.8146973e-06  ;;  %v506_v14 = vmul.f32 %v378_v6, %v378_v6  ;;  %v507_v15 = vmul.f32 %v379_v7, %v379_v7  ;;  %v384_v17 = vmax.f32 %v256_v4, 3.8146973e-06 }
  0x90   : > { %760 = vst [vmem:[%s1311_s17 + $0x370] sm:$0xff] %v986_v5  ;;  %v508_v16 = vmul.f32 %v380_v8, %v380_v8  ;;  %761 = vst [vmem:[%s1311_s17 + $0x378] sm:$0xff] %v987_v10  ;;  %v509_v18 = vmul.f32 %v381_v11, %v381_v11  ;;  %v510_v19 = vmul.f32 %v382_v12, %v382_v12  ;;  %v385_v21 = vmax.f32 %v257_v9, 3.8146973e-06 }
  0x91   : > { %v511_v20 = vmul.f32 %v383_v13, %v383_v13  ;;  %v988_v25 = vadd.f32 -1.4551915e-11, %v506_v14  ;;  %v989_v26 = vadd.f32 -1.4551915e-11, %v507_v15  ;;  %v512_v28 = vmul.f32 %v384_v17, %v384_v17 }
  0x92   : > { %v990_v27 = vadd.f32 -1.4551915e-11, %v508_v16  ;;  %v991_v32 = vadd.f32 -1.4551915e-11, %v509_v18  ;;  %v992_v33 = vadd.f32 -1.4551915e-11, %v510_v19  ;;  %v513_v35 = vmul.f32 %v385_v21, %v385_v21 }
  0x93   : > { %v993_v34 = vadd.f32 -1.4551915e-11, %v511_v20  ;;  %762 = vst [vmem:[%s1311_s17 + $0x380] sm:$0xff] %v988_v25  ;;  %763 = vst [vmem:[%s1311_s17 + $0x388] sm:$0xff] %v989_v26  ;;  %v994_v37 = vadd.f32 -1.4551915e-11, %v512_v28  ;;  %v386_v38 = vmax.f32 %v258_v22, 3.8146973e-06  ;;  %v387_v39 = vmax.f32 %v259_v23, 3.8146973e-06 }
  0x94   : > { %764 = vst [vmem:[%s1311_s17 + $0x390] sm:$0xff] %v990_v27  ;;  %v388_v40 = vmax.f32 %v260_v24, 3.8146973e-06  ;;  %765 = vst [vmem:[%s1311_s17 + $0x398] sm:$0xff] %v991_v32  ;;  %v995_v42 = vadd.f32 -1.4551915e-11, %v513_v35  ;;  %v389_v43 = vmax.f32 %v261_v29, 3.8146973e-06  ;;  %v390_v44 = vmax.f32 %v262_v30, 3.8146973e-06 }
  0x95   : > { %766 = vst [vmem:[%s1311_s17 + $0x3a0] sm:$0xff] %v992_v33  ;;  %767 = vst [vmem:[%s1311_s17 + $0x3a8] sm:$0xff] %v993_v34  ;;  %v391_v45 = vmax.f32 %v263_v31, 3.8146973e-06  ;;  %v514_v46 = vmul.f32 %v386_v38, %v386_v38  ;;  %v515_v47 = vmul.f32 %v387_v39, %v387_v39  ;;  %v392_v49 = vmax.f32 %v264_v36, 3.8146973e-06 }
  0x96   : > { %768 = vst [vmem:[%s1311_s17 + $0x3b0] sm:$0xff] %v994_v37  ;;  %v516_v48 = vmul.f32 %v388_v40, %v388_v40  ;;  %769 = vst [vmem:[%s1311_s17 + $0x3b8] sm:$0xff] %v995_v42  ;;  %v517_v50 = vmul.f32 %v389_v43, %v389_v43  ;;  %v518_v51 = vmul.f32 %v390_v44, %v390_v44  ;;  %v393_v53 = vmax.f32 %v265_v41, 3.8146973e-06 }
  0x97   : > { %v519_v52 = vmul.f32 %v391_v45, %v391_v45  ;;  %v996_v54 = vadd.f32 -1.4551915e-11, %v514_v46  ;;  %v997_v55 = vadd.f32 -1.4551915e-11, %v515_v47  ;;  %v520_v57 = vmul.f32 %v392_v49, %v392_v49 }
  0x98   : > { %v998_v56 = vadd.f32 -1.4551915e-11, %v516_v48  ;;  %v999_v58 = vadd.f32 -1.4551915e-11, %v517_v50  ;;  %v1000_v59 = vadd.f32 -1.4551915e-11, %v518_v51  ;;  %v521_v61 = vmul.f32 %v393_v53, %v393_v53 }
  0x99   : > { %v1001_v60 = vadd.f32 -1.4551915e-11, %v519_v52  ;;  %770 = vst [vmem:[%s1311_s17 + $0x3c0] sm:$0xff] %v996_v54  ;;  %771 = vst [vmem:[%s1311_s17 + $0x3c8] sm:$0xff] %v997_v55  ;;  %v1002_v62 = vadd.f32 -1.4551915e-11, %v520_v57 }
  0x9a   : > { %772 = vst [vmem:[%s1311_s17 + $0x3d0] sm:$0xff] %v998_v56  ;;  %773 = vst [vmem:[%s1311_s17 + $0x3d8] sm:$0xff] %v999_v58  ;;  %v1003_v63 = vadd.f32 -1.4551915e-11, %v521_v61 }
  0x9b   : > { %774 = vst [vmem:[%s1311_s17 + $0x3e0] sm:$0xff] %v1000_v59  ;;  %775 = vst [vmem:[%s1311_s17 + $0x3e8] sm:$0xff] %v1001_v60 }
  0x9c   : > { %776 = vst [vmem:[%s1311_s17 + $0x3f0] sm:$0xff] %v1002_v62  ;;  %777 = vst [vmem:[%s1311_s17 + $0x3f8] sm:$0xff] %v1003_v63 }
  0x9d   : > { %1107 = shalt.err (!%p1104_p2)
}
  0x9e   : > { %s1108_s13 = scalar_lea.hbm %s1554_s29, 16384  ;;  %s1112_s20 = scalar_lea.hbm %s1606_s1, 32768 }
  0x9f   : > { %p1109_p4 = scmp.ne.s32.totalorder %s1554_s29, %s1108_s13  ;;  %p1113_p9 = scmp.lt.u32.totalorder %s1554_s29, %s1606_s1 }
  0xa0   : > { %p1114_p1 = scmp.lt.u32.totalorder %s1112_s20, %s1108_s13  ;;  %p1116_p6 = scmp.lt.u32.totalorder %s1108_s13, %s1554_s29 }
  0xa1   : > { %p1110_p5 = pnand %p1109_p4, %p1613_p11 }
  0xa2   : > { %p1115_p3 = por %p1114_p1, %p1113_p9 }
  0xa3   : > { %p1111_p7 = pneg %p1110_p5 }
  0xa4   : > { %p1117_p12 = por %p1116_p6, %p1115_p3 }
  0xa6   : > { %p1118_p13 = pnand %p1117_p12, %p1111_p7 }
  0xa8   : > { %1121 = shalt.err (!%p1118_p13)
}
  0xa9   : > { %s1166_s24 = smov 4096   ;;  %s1167_s26 = smov 256  }
  0xaa   : > { %1016 = dma.vmem_to_hbm [thread:$0]  (%p1613_p11), %s1556_s27, 16384, %s1554_s29, %s779_s2, %s1166_s24, %s1166_s24, %s1167_s26  }
  0xab PF: > { %s808_s30 = sand.u32 1, %s1148_s6   ;;  %p1614_p8 = scmp.ne.s32.totalorder %s1611_s19, 0 }
  0xac   : > { %p1615_p10 = scmp.ge.s32.totalorder %s1160_s9, 2  ;;  %s809_s17 = scalar_lea.sflag [#allocation4], %s808_s30 }
  0xae   : > { %p1023_p0 = pnand %p1615_p10, %p1614_p8 }
  0xb0   : > { %1143 = dma.done.wait (!%p1023_p0), %s809_s17, 16384  }
  0xb1   : > { %1145 = vsyncadd (!%p1023_p0), %s809_s17, 4294950912  ;;  %p14_p2 = scmp.ge.s32.totalorder %s1203_s12, 4   ;;  %s1616_s6 = smov %s1152_s7 }
  0xb2   : > { %s1617_s7 = smov %s1156_s8  ;;  %s1618_s8 = smov %s1215_s15 }
  0xb3   : > { %s1619_s9 = smov %s1203_s12  ;;  %16 = sbr.rel (!%p14_p2) target bundleno = 5 (0x5), region = 69 }
  0xba   :  { %814 = vsyncpa [#allocation3], 1 }
  0xbb   :  { %816 = vsyncpa [#allocation3 + $0x1], 1 }
  0xbc   :  { %817 = vsyncpa [#allocation4], 1 }
  0xbd   :  { %819 = vsyncpa [#allocation4 + $0x1], 1 }

</bundles_post_ra>
